<compile_context>
chip_gen: v5e
topology: v5e:2x2
jax: 0.10.0
libtpu: 0.0.40
codegen_flags: <defaults>
</compile_context>

<pallas_src>
import functools

import jax
import jax.numpy as jnp
from jax.experimental import pallas as pl
from jax.experimental.pallas import tpu as pltpu

LANE = 128


def _round_up(n, m):
    return ((n + m - 1) // m) * m


def _pad2d(a, rows, cols):
    out = jnp.zeros((rows, cols), a.dtype)
    return out.at[: a.shape[0], : a.shape[1]].set(a)


# ----------------------------------------------------------------------------
# Fused kernel: embed-gather -> cross-attention (+residual) -> LN -> LM head
# ----------------------------------------------------------------------------
def _fused_kernel(ids_ref,                                   # scalar prefetch (SMEM)
                  patches_ref, emb_ref, wq_ref, wpk_ref, bk_ref,
                  wpvo_ref, bvo_ref, wlm_ref, blm_ref,       # VMEM inputs
                  o_ref,                                      # VMEM output
                  text_ref,                                   # VMEM scratch
                  *, batches_per_group, seq_len, num_patches, d_model, eps):
    rows = batches_per_group * seq_len
    base = pl.program_id(0) * rows

    # 1) In-kernel embedding gather: token ids from SMEM, rows from the VMEM
    #    embedding table.  (Pad lanes of the table are zero by construction.)
    for i in range(rows):
        tok = ids_ref[base + i]
        text_ref[pl.ds(i, 1), :] = emb_ref[pl.ds(tok, 1), :]
    x = text_ref[...]                                        # (rows, Dp) f32

    # 2) Shared projections (patch-embed + Wk / Wv@Wo folded at init;
    #    1/sqrt(D) folded into Wq).  q, k, v' are mutually independent.
    q = jnp.dot(x, wq_ref[...], preferred_element_type=jnp.float32)
    k = jnp.dot(patches_ref[...], wpk_ref[...],
                preferred_element_type=jnp.float32) + bk_ref[...]
    vo = jnp.dot(patches_ref[...], wpvo_ref[...],
                 preferred_element_type=jnp.float32) + bvo_ref[...]

    # 3) Per-image attention, statically unrolled: scores stay (T, Nv),
    #    no block-diagonal mask, no redundant MXU work.
    fused_rows = []
    for b in range(batches_per_group):
        qb = q[b * seq_len:(b + 1) * seq_len]
        kb = k[b * num_patches:(b + 1) * num_patches]
        vb = vo[b * num_patches:(b + 1) * num_patches]
        # Contract last dims directly: no k.T -> no XLU transpose before MXU.
        s = jax.lax.dot_general(qb, kb, (((1,), (1,)), ((), ())),
                                preferred_element_type=jnp.float32)  # (T, Nv)
        s = s - s.max(axis=-1, keepdims=True)
        p = jnp.exp(s)
        p = p / p.sum(axis=-1, keepdims=True)
        attn = jnp.dot(p, vb, preferred_element_type=jnp.float32)
        fused_rows.append(x[b * seq_len:(b + 1) * seq_len] + attn)
    fused = (jnp.concatenate(fused_rows, axis=0)
             if batches_per_group > 1 else fused_rows[0])

    # 4) LayerNorm over the real d_model lanes (pad lanes of `fused` are
    #    exactly zero by weight-padding construction); gamma/beta are already
    #    folded into wlm/blm.
    inv_d = 1.0 / d_model
    mu = fused.sum(axis=-1, keepdims=True) * inv_d
    lane = jax.lax.broadcasted_iota(jnp.int32, fused.shape, 1)
    xc = jnp.where(lane < d_model, fused - mu, 0.0)   # mask pad lanes for var
    var = (xc * xc).sum(axis=-1, keepdims=True) * inv_d
    xn = xc * jax.lax.rsqrt(var + eps)
    logits = jnp.dot(xn, wlm_ref[...],
                     preferred_element_type=jnp.float32) + blm_ref[...]
    o_ref[...] = logits.astype(o_ref.dtype)


def fused_vision_text_forward(input_ids_flat, patches, embed_table_pad,
                              wq, wpk, bk, wpvo, bvo, w_lm, b_lm,
                              *, seq_len, num_patches, d_model,
                              num_groups, eps=1e-5):
    m_patch, k_pad = patches.shape
    vocab, d_pad = embed_table_pad.shape
    _, v_pad = w_lm.shape
    m_text = input_ids_flat.shape[0]
    assert m_text % (num_groups * seq_len) == 0
    assert m_patch % (num_groups * num_patches) == 0
    batches_per_group = m_text // (num_groups * seq_len)

    kernel = functools.partial(
        _fused_kernel, batches_per_group=batches_per_group,
        seq_len=seq_len, num_patches=num_patches, d_model=d_model, eps=eps)

    grid_spec = pltpu.PrefetchScalarGridSpec(
        num_scalar_prefetch=1,                 # input_ids -> SMEM
        grid=(num_groups,),
        in_specs=[
            pl.BlockSpec((m_patch // num_groups, k_pad), lambda g, ids: (g, 0)),
            pl.BlockSpec((vocab, d_pad), lambda g, ids: (0, 0)),
            pl.BlockSpec((d_pad, d_pad), lambda g, ids: (0, 0)),   # wq (scaled)
            pl.BlockSpec((k_pad, d_pad), lambda g, ids: (0, 0)),   # wpk
            pl.BlockSpec((1, d_pad), lambda g, ids: (0, 0)),       # bk
            pl.BlockSpec((k_pad, d_pad), lambda g, ids: (0, 0)),   # wpvo
            pl.BlockSpec((1, d_pad), lambda g, ids: (0, 0)),       # bvo
            pl.BlockSpec((d_pad, v_pad), lambda g, ids: (0, 0)),   # w_lm (LN folded)
            pl.BlockSpec((1, v_pad), lambda g, ids: (0, 0)),       # b_lm (LN folded)
        ],
        out_specs=pl.BlockSpec((m_text // num_groups, v_pad),
                               lambda g, ids: (g, 0)),
        scratch_shapes=[pltpu.VMEM((m_text // num_groups, d_pad), jnp.float32)],
    )

    return pl.pallas_call(
        kernel,
        out_shape=jax.ShapeDtypeStruct((m_text, v_pad), jnp.float32),
        grid_spec=grid_spec,
        compiler_params=pltpu.CompilerParams(
            dimension_semantics=("parallel",)),
    )(input_ids_flat, patches, embed_table_pad,
      wq, wpk, bk, wpvo, bvo, w_lm, b_lm)


# ----------------------------------------------------------------------------
# Model glue (plain JAX): patchify, tokenization stand-in, weight folding.
# ----------------------------------------------------------------------------
class VisionTextModelPallas:
    def __init__(self, key, *, channels=4, image_size=16, patch=4,
                 hidden=32, vocab=64, seq_len=8, ln_eps=1e-5):
        self.patch = patch
        self.hidden = hidden
        self.vocab = vocab
        self.seq_len = seq_len
        self.ln_eps = ln_eps
        patch_dim = channels * patch * patch
        self.patch_dim = patch_dim
        self.k_pad = _round_up(patch_dim, LANE)
        self.d_pad = _round_up(hidden, LANE)
        self.v_pad = _round_up(vocab, LANE)

        ks = jax.random.split(key, 8)
        s = 0.02
        f32 = jnp.float32
        # ---- raw (unpadded) parameters: same semantics as the torch module --
        self.w_patch = (jax.random.normal(ks[0], (patch_dim, hidden)) * s).astype(f32)
        self.b_patch = jnp.zeros((1, hidden), f32)
        self.embed_table = (jax.random.normal(ks[1], (vocab, hidden)) * s).astype(f32)
        self.wq = (jax.random.normal(ks[2], (hidden, hidden)) * s).astype(f32)
        self.wk = (jax.random.normal(ks[3], (hidden, hidden)) * s).astype(f32)
        self.wv = (jax.random.normal(ks[4], (hidden, hidden)) * s).astype(f32)
        self.wo = (jax.random.normal(ks[5], (hidden, hidden)) * s).astype(f32)
        self.ln_gamma = jnp.ones((hidden,), f32)
        self.ln_beta = jnp.zeros((hidden,), f32)
        self.w_lm = (jax.random.normal(ks[6], (hidden, vocab)) * s).astype(f32)
        self.b_lm = jnp.zeros((1, vocab), f32)
        self._tok_key = ks[7]
        self._tok_calls = 0

        # ---- constant-folded, lane-padded kernel parameters (built once) ----
        scale = 1.0 / (hidden ** 0.5)
        wvo = self.wv @ self.wo                 # fold Wo into V projection
        wpk = self.w_patch @ self.wk            # fold patch-embed into K
        wpvo = self.w_patch @ wvo               # fold patch-embed into V'
        bk = self.b_patch @ self.wk
        bvo = self.b_patch @ wvo
        w_lm_eff = self.ln_gamma[:, None] * self.w_lm       # fold LN affine
        b_lm_eff = self.b_lm + self.ln_beta[None, :] @ self.w_lm

        self.embed_table_pad = _pad2d(self.embed_table, vocab, self.d_pad)
        self.wq_pad = _pad2d(self.wq * scale, self.d_pad, self.d_pad)  # 1/sqrt(D) folded
        self.wpk_pad = _pad2d(wpk, self.k_pad, self.d_pad)
        self.bk_pad = _pad2d(bk, 1, self.d_pad)
        self.wpvo_pad = _pad2d(wpvo, self.k_pad, self.d_pad)
        self.bvo_pad = _pad2d(bvo, 1, self.d_pad)
        self.w_lm_pad = _pad2d(w_lm_eff, self.d_pad, self.v_pad)
        self.b_lm_pad = _pad2d(b_lm_eff, 1, self.v_pad)

    # --- vision patchify: NCHW -> (B*Nv, C*p*p) rows, lane-padded to 128 -----
    def _patchify(self, images):
        B, C, H, W = images.shape
        p = self.patch
        nh, nw = H // p, W // p
        x = images.reshape(B, C, nh, p, nw, p)
        x = jnp.transpose(x, (0, 2, 4, 1, 3, 5))
        flat = x.reshape(B * nh * nw, C * p * p)
        if flat.shape[1] < self.k_pad:                 # lane-dense patch rows
            flat = jnp.pad(flat, ((0, 0), (0, self.k_pad - flat.shape[1])))
        return flat, nh * nw

    # --- text_decoder.encode_text(reports): tokenization stand-in -----------
    def encode_text(self, batch_size, reports=None):
        # TODO(synk): real tokenizer has no Pallas/JAX equivalent; ids synthesized.
        seed = self._tok_calls if reports is None else int(reports)
        self._tok_calls += 1
        key = jax.random.fold_in(self._tok_key, seed)
        input_ids = jax.random.randint(
            key, (batch_size, self.seq_len), 0, self.vocab, dtype=jnp.int32)
        attention_mask = jnp.ones((batch_size, self.seq_len), jnp.int32)
        return input_ids, attention_mask

    # --- full forward (single fused Pallas kernel) ----------------------------
    def forward(self, images, reports=None, labels=None):
        B = images.shape[0]
        patches, num_patches = self._patchify(images)
        input_ids, attention_mask = self.encode_text(B, reports)

        # Split across v7x's two TensorCores only when the per-group work is
        # MXU-scale; at tiny sizes (and on single-TC v5e/v6e) one group avoids
        # duplicated weight DMA and extra grid-step overhead.
        rows = B * self.seq_len
        num_groups = 2 if (B % 2 == 0 and rows // 2 >= 256) else 1

        logits_pad = fused_vision_text_forward(
            input_ids.reshape(-1), patches, self.embed_table_pad,
            self.wq_pad, self.wpk_pad, self.bk_pad,
            self.wpvo_pad, self.bvo_pad, self.w_lm_pad, self.b_lm_pad,
            seq_len=self.seq_len, num_patches=num_patches,
            d_model=self.hidden, num_groups=num_groups, eps=self.ln_eps)

        logits = logits_pad[:, : self.vocab].reshape(B, self.seq_len, self.vocab)
        # TODO(synk): full multi-layer causal HF decoder / generate() not
        # reproduced; decoder head = LayerNorm + LM projection.  attention_mask
        # (all ones) is returned but not applied.
        return logits, attention_mask

    # --- pure-JAX unpadded reference (for correctness checking) --------------
    def reference_forward(self, images, reports=None):
        B = images.shape[0]
        C, H, W = images.shape[1:]
        p = self.patch
        nh, nw = H // p, W // p
        x = images.reshape(B, C, nh, p, nw, p)
        x = jnp.transpose(x, (0, 2, 4, 1, 3, 5)).reshape(B * nh * nw, C * p * p)
        vis = (x @ self.w_patch + self.b_patch).reshape(B, nh * nw, self.hidden)
        input_ids, attention_mask = self.encode_text(B, reports)
        text = jnp.take(self.embed_table, input_ids, axis=0)
        scale = 1.0 / (self.hidden ** 0.5)
        q = (text @ self.wq) * scale
        k = vis @ self.wk
        v = vis @ self.wv
        s = jnp.einsum("btd,bnd->btn", q, k)
        s = s - s.max(-1, keepdims=True)
        pp = jnp.exp(s)
        pp = pp / pp.sum(-1, keepdims=True)
        attn = jnp.einsum("btn,bnd->btd", pp, v)
        fused = text + attn @ self.wo
        mu = fused.mean(-1, keepdims=True)
        var = jnp.mean((fused - mu) ** 2, -1, keepdims=True)
        xn = (fused - mu) * jax.lax.rsqrt(var + self.ln_eps)
        xn = xn * self.ln_gamma + self.ln_beta
        logits = xn @ self.w_lm + self.b_lm
        return logits, attention_mask


if __name__ == "__main__":
    key = jax.random.PRNGKey(0)
    pkey, ikey = jax.random.split(key)

    model = VisionTextModelPallas(pkey, channels=4, image_size=16, patch=4,
                                  hidden=32, vocab=64, seq_len=8)

    # Guard the LayerNorm's zero-pad-lane assumption (perf-review concern):
    # pad lanes of everything feeding `fused` must be exactly zero.
    for name, w in [("embed", model.embed_table_pad),
                    ("wpvo", model.wpvo_pad), ("bvo", model.bvo_pad)]:
        assert float(jnp.abs(w[:, model.hidden:]).max()) == 0.0, name

    images = jax.random.normal(ikey, (2, 4, 16, 16), dtype=jnp.float32)  # NCHW

    logits, attn_mask = model.forward(images, reports=0)
    jax.block_until_ready(logits)

    assert logits.shape == (2, 8, 64), logits.shape
    assert attn_mask.shape == (2, 8), attn_mask.shape
    assert bool(jnp.all(jnp.isfinite(logits)))

    # Compare against the pure-JAX reference.  Exact softmax reciprocal +
    # constant-folded weights => only fp32 reassociation error (~1e-6).
    ref_logits, _ = model.reference_forward(images, reports=0)
    max_err = float(jnp.max(jnp.abs(logits - ref_logits)))
    assert max_err < 1e-3, f"max |pallas - ref| = {max_err}"

    print("KERNEL_OK")
</pallas_src>

<mosaic_0001>
module attributes {stable_mosaic.version = 11 : i64} {
  func.func @_fused_kernel(%arg0: i32, %arg1: memref<16xi32, #tpu.memory_space<smem>>, %arg2: memref<32x128xf32, #tpu.memory_space<vmem>>, %arg3: memref<64x128xf32, #tpu.memory_space<vmem>>, %arg4: memref<128x128xf32, #tpu.memory_space<vmem>>, %arg5: memref<128x128xf32, #tpu.memory_space<vmem>>, %arg6: memref<1x128xf32, #tpu.memory_space<vmem>>, %arg7: memref<128x128xf32, #tpu.memory_space<vmem>>, %arg8: memref<1x128xf32, #tpu.memory_space<vmem>>, %arg9: memref<128x128xf32, #tpu.memory_space<vmem>>, %arg10: memref<1x128xf32, #tpu.memory_space<vmem>>, %arg11: memref<16x128xf32, #tpu.memory_space<vmem>>, %arg12: memref<16x128xf32, #tpu.memory_space<vmem>>) attributes {dimension_semantics = [#tpu.dimension_semantics<parallel>], iteration_bounds = array<i64: 1>, scalar_prefetch = 1 : i64, scratch_operands = 1 : i64, tpu.core_type = #tpu.core_type<tc>, window_params = [{transform_indices = @transform_0, window_bounds = array<i64: 32, 128>}, {pipeline_mode = #tpu.pipeline_mode<synchronous>, transform_indices = @transform_1, window_bounds = array<i64: 64, 128>}, {pipeline_mode = #tpu.pipeline_mode<synchronous>, transform_indices = @transform_2, window_bounds = array<i64: 128, 128>}, {pipeline_mode = #tpu.pipeline_mode<synchronous>, transform_indices = @transform_3, window_bounds = array<i64: 128, 128>}, {pipeline_mode = #tpu.pipeline_mode<synchronous>, transform_indices = @transform_4, window_bounds = array<i64: 1, 128>}, {pipeline_mode = #tpu.pipeline_mode<synchronous>, transform_indices = @transform_5, window_bounds = array<i64: 128, 128>}, {pipeline_mode = #tpu.pipeline_mode<synchronous>, transform_indices = @transform_6, window_bounds = array<i64: 1, 128>}, {pipeline_mode = #tpu.pipeline_mode<synchronous>, transform_indices = @transform_7, window_bounds = array<i64: 128, 128>}, {pipeline_mode = #tpu.pipeline_mode<synchronous>, transform_indices = @transform_8, window_bounds = array<i64: 1, 128>}, {transform_indices = @transform_9, window_bounds = array<i64: 16, 128>}]} {
    %c16_i32 = arith.constant 16 : i32
    %0 = arith.muli %arg0, %c16_i32 : i32
    %c0_i32 = arith.constant 0 : i32
    %1 = arith.addi %0, %c0_i32 : i32
    %2 = arith.index_cast %1 : i32 to index
    %3 = memref.load %arg1[%2] : memref<16xi32, #tpu.memory_space<smem>>
    %4 = arith.index_cast %3 : i32 to index
    %c0 = arith.constant 0 : index
    %5 = vector.load %arg3[%4, %c0] : memref<64x128xf32, #tpu.memory_space<vmem>>, vector<1x128xf32>
    %c0_0 = arith.constant 0 : index
    %c0_1 = arith.constant 0 : index
    %6 = vector.load %arg12[%c0_0, %c0_1] : memref<16x128xf32, #tpu.memory_space<vmem>>, vector<1x128xf32>
    tpu.vector_store %arg12[%c0_0, %c0_1], %5 {strides = array<i32>} : memref<16x128xf32, #tpu.memory_space<vmem>>, vector<1x128xf32>,
    %c1_i32 = arith.constant 1 : i32
    %7 = arith.addi %0, %c1_i32 : i32
    %8 = arith.index_cast %7 : i32 to index
    %9 = memref.load %arg1[%8] : memref<16xi32, #tpu.memory_space<smem>>
    %10 = arith.index_cast %9 : i32 to index
    %c0_2 = arith.constant 0 : index
    %11 = vector.load %arg3[%10, %c0_2] : memref<64x128xf32, #tpu.memory_space<vmem>>, vector<1x128xf32>
    %c1 = arith.constant 1 : index
    %c0_3 = arith.constant 0 : index
    %12 = vector.load %arg12[%c1, %c0_3] : memref<16x128xf32, #tpu.memory_space<vmem>>, vector<1x128xf32>
    tpu.vector_store %arg12[%c1, %c0_3], %11 {strides = array<i32>} : memref<16x128xf32, #tpu.memory_space<vmem>>, vector<1x128xf32>,
    %c2_i32 = arith.constant 2 : i32
    %13 = arith.addi %0, %c2_i32 : i32
    %14 = arith.index_cast %13 : i32 to index
    %15 = memref.load %arg1[%14] : memref<16xi32, #tpu.memory_space<smem>>
    %16 = arith.index_cast %15 : i32 to index
    %c0_4 = arith.constant 0 : index
    %17 = vector.load %arg3[%16, %c0_4] : memref<64x128xf32, #tpu.memory_space<vmem>>, vector<1x128xf32>
    %c2 = arith.constant 2 : index
    %c0_5 = arith.constant 0 : index
    %18 = vector.load %arg12[%c2, %c0_5] : memref<16x128xf32, #tpu.memory_space<vmem>>, vector<1x128xf32>
    tpu.vector_store %arg12[%c2, %c0_5], %17 {strides = array<i32>} : memref<16x128xf32, #tpu.memory_space<vmem>>, vector<1x128xf32>,
    %c3_i32 = arith.constant 3 : i32
    %19 = arith.addi %0, %c3_i32 : i32
    %20 = arith.index_cast %19 : i32 to index
    %21 = memref.load %arg1[%20] : memref<16xi32, #tpu.memory_space<smem>>
    %22 = arith.index_cast %21 : i32 to index
    %c0_6 = arith.constant 0 : index
    %23 = vector.load %arg3[%22, %c0_6] : memref<64x128xf32, #tpu.memory_space<vmem>>, vector<1x128xf32>
    %c3 = arith.constant 3 : index
    %c0_7 = arith.constant 0 : index
    %24 = vector.load %arg12[%c3, %c0_7] : memref<16x128xf32, #tpu.memory_space<vmem>>, vector<1x128xf32>
    tpu.vector_store %arg12[%c3, %c0_7], %23 {strides = array<i32>} : memref<16x128xf32, #tpu.memory_space<vmem>>, vector<1x128xf32>,
    %c4_i32 = arith.constant 4 : i32
    %25 = arith.addi %0, %c4_i32 : i32
    %26 = arith.index_cast %25 : i32 to index
    %27 = memref.load %arg1[%26] : memref<16xi32, #tpu.memory_space<smem>>
    %28 = arith.index_cast %27 : i32 to index
    %c0_8 = arith.constant 0 : index
    %29 = vector.load %arg3[%28, %c0_8] : memref<64x128xf32, #tpu.memory_space<vmem>>, vector<1x128xf32>
    %c4 = arith.constant 4 : index
    %c0_9 = arith.constant 0 : index
    %30 = vector.load %arg12[%c4, %c0_9] : memref<16x128xf32, #tpu.memory_space<vmem>>, vector<1x128xf32>
    tpu.vector_store %arg12[%c4, %c0_9], %29 {strides = array<i32>} : memref<16x128xf32, #tpu.memory_space<vmem>>, vector<1x128xf32>,
    %c5_i32 = arith.constant 5 : i32
    %31 = arith.addi %0, %c5_i32 : i32
    %32 = arith.index_cast %31 : i32 to index
    %33 = memref.load %arg1[%32] : memref<16xi32, #tpu.memory_space<smem>>
    %34 = arith.index_cast %33 : i32 to index
    %c0_10 = arith.constant 0 : index
    %35 = vector.load %arg3[%34, %c0_10] : memref<64x128xf32, #tpu.memory_space<vmem>>, vector<1x128xf32>
    %c5 = arith.constant 5 : index
    %c0_11 = arith.constant 0 : index
    %36 = vector.load %arg12[%c5, %c0_11] : memref<16x128xf32, #tpu.memory_space<vmem>>, vector<1x128xf32>
    tpu.vector_store %arg12[%c5, %c0_11], %35 {strides = array<i32>} : memref<16x128xf32, #tpu.memory_space<vmem>>, vector<1x128xf32>,
    %c6_i32 = arith.constant 6 : i32
    %37 = arith.addi %0, %c6_i32 : i32
    %38 = arith.index_cast %37 : i32 to index
    %39 = memref.load %arg1[%38] : memref<16xi32, #tpu.memory_space<smem>>
    %40 = arith.index_cast %39 : i32 to index
    %c0_12 = arith.constant 0 : index
    %41 = vector.load %arg3[%40, %c0_12] : memref<64x128xf32, #tpu.memory_space<vmem>>, vector<1x128xf32>
    %c6 = arith.constant 6 : index
    %c0_13 = arith.constant 0 : index
    %42 = vector.load %arg12[%c6, %c0_13] : memref<16x128xf32, #tpu.memory_space<vmem>>, vector<1x128xf32>
    tpu.vector_store %arg12[%c6, %c0_13], %41 {strides = array<i32>} : memref<16x128xf32, #tpu.memory_space<vmem>>, vector<1x128xf32>,
    %c7_i32 = arith.constant 7 : i32
    %43 = arith.addi %0, %c7_i32 : i32
    %44 = arith.index_cast %43 : i32 to index
    %45 = memref.load %arg1[%44] : memref<16xi32, #tpu.memory_space<smem>>
    %46 = arith.index_cast %45 : i32 to index
    %c0_14 = arith.constant 0 : index
    %47 = vector.load %arg3[%46, %c0_14] : memref<64x128xf32, #tpu.memory_space<vmem>>, vector<1x128xf32>
    %c7 = arith.constant 7 : index
    %c0_15 = arith.constant 0 : index
    %48 = vector.load %arg12[%c7, %c0_15] : memref<16x128xf32, #tpu.memory_space<vmem>>, vector<1x128xf32>
    tpu.vector_store %arg12[%c7, %c0_15], %47 {strides = array<i32>} : memref<16x128xf32, #tpu.memory_space<vmem>>, vector<1x128xf32>,
    %c8_i32 = arith.constant 8 : i32
    %49 = arith.addi %0, %c8_i32 : i32
    %50 = arith.index_cast %49 : i32 to index
    %51 = memref.load %arg1[%50] : memref<16xi32, #tpu.memory_space<smem>>
    %52 = arith.index_cast %51 : i32 to index
    %c0_16 = arith.constant 0 : index
    %53 = vector.load %arg3[%52, %c0_16] : memref<64x128xf32, #tpu.memory_space<vmem>>, vector<1x128xf32>
    %c8 = arith.constant 8 : index
    %c0_17 = arith.constant 0 : index
    %54 = vector.load %arg12[%c8, %c0_17] : memref<16x128xf32, #tpu.memory_space<vmem>>, vector<1x128xf32>
    tpu.vector_store %arg12[%c8, %c0_17], %53 {strides = array<i32>} : memref<16x128xf32, #tpu.memory_space<vmem>>, vector<1x128xf32>,
    %c9_i32 = arith.constant 9 : i32
    %55 = arith.addi %0, %c9_i32 : i32
    %56 = arith.index_cast %55 : i32 to index
    %57 = memref.load %arg1[%56] : memref<16xi32, #tpu.memory_space<smem>>
    %58 = arith.index_cast %57 : i32 to index
    %c0_18 = arith.constant 0 : index
    %59 = vector.load %arg3[%58, %c0_18] : memref<64x128xf32, #tpu.memory_space<vmem>>, vector<1x128xf32>
    %c9 = arith.constant 9 : index
    %c0_19 = arith.constant 0 : index
    %60 = vector.load %arg12[%c9, %c0_19] : memref<16x128xf32, #tpu.memory_space<vmem>>, vector<1x128xf32>
    tpu.vector_store %arg12[%c9, %c0_19], %59 {strides = array<i32>} : memref<16x128xf32, #tpu.memory_space<vmem>>, vector<1x128xf32>,
    %c10_i32 = arith.constant 10 : i32
    %61 = arith.addi %0, %c10_i32 : i32
    %62 = arith.index_cast %61 : i32 to index
    %63 = memref.load %arg1[%62] : memref<16xi32, #tpu.memory_space<smem>>
    %64 = arith.index_cast %63 : i32 to index
    %c0_20 = arith.constant 0 : index
    %65 = vector.load %arg3[%64, %c0_20] : memref<64x128xf32, #tpu.memory_space<vmem>>, vector<1x128xf32>
    %c10 = arith.constant 10 : index
    %c0_21 = arith.constant 0 : index
    %66 = vector.load %arg12[%c10, %c0_21] : memref<16x128xf32, #tpu.memory_space<vmem>>, vector<1x128xf32>
    tpu.vector_store %arg12[%c10, %c0_21], %65 {strides = array<i32>} : memref<16x128xf32, #tpu.memory_space<vmem>>, vector<1x128xf32>,
    %c11_i32 = arith.constant 11 : i32
    %67 = arith.addi %0, %c11_i32 : i32
    %68 = arith.index_cast %67 : i32 to index
    %69 = memref.load %arg1[%68] : memref<16xi32, #tpu.memory_space<smem>>
    %70 = arith.index_cast %69 : i32 to index
    %c0_22 = arith.constant 0 : index
    %71 = vector.load %arg3[%70, %c0_22] : memref<64x128xf32, #tpu.memory_space<vmem>>, vector<1x128xf32>
    %c11 = arith.constant 11 : index
    %c0_23 = arith.constant 0 : index
    %72 = vector.load %arg12[%c11, %c0_23] : memref<16x128xf32, #tpu.memory_space<vmem>>, vector<1x128xf32>
    tpu.vector_store %arg12[%c11, %c0_23], %71 {strides = array<i32>} : memref<16x128xf32, #tpu.memory_space<vmem>>, vector<1x128xf32>,
    %c12_i32 = arith.constant 12 : i32
    %73 = arith.addi %0, %c12_i32 : i32
    %74 = arith.index_cast %73 : i32 to index
    %75 = memref.load %arg1[%74] : memref<16xi32, #tpu.memory_space<smem>>
    %76 = arith.index_cast %75 : i32 to index
    %c0_24 = arith.constant 0 : index
    %77 = vector.load %arg3[%76, %c0_24] : memref<64x128xf32, #tpu.memory_space<vmem>>, vector<1x128xf32>
    %c12 = arith.constant 12 : index
    %c0_25 = arith.constant 0 : index
    %78 = vector.load %arg12[%c12, %c0_25] : memref<16x128xf32, #tpu.memory_space<vmem>>, vector<1x128xf32>
    tpu.vector_store %arg12[%c12, %c0_25], %77 {strides = array<i32>} : memref<16x128xf32, #tpu.memory_space<vmem>>, vector<1x128xf32>,
    %c13_i32 = arith.constant 13 : i32
    %79 = arith.addi %0, %c13_i32 : i32
    %80 = arith.index_cast %79 : i32 to index
    %81 = memref.load %arg1[%80] : memref<16xi32, #tpu.memory_space<smem>>
    %82 = arith.index_cast %81 : i32 to index
    %c0_26 = arith.constant 0 : index
    %83 = vector.load %arg3[%82, %c0_26] : memref<64x128xf32, #tpu.memory_space<vmem>>, vector<1x128xf32>
    %c13 = arith.constant 13 : index
    %c0_27 = arith.constant 0 : index
    %84 = vector.load %arg12[%c13, %c0_27] : memref<16x128xf32, #tpu.memory_space<vmem>>, vector<1x128xf32>
    tpu.vector_store %arg12[%c13, %c0_27], %83 {strides = array<i32>} : memref<16x128xf32, #tpu.memory_space<vmem>>, vector<1x128xf32>,
    %c14_i32 = arith.constant 14 : i32
    %85 = arith.addi %0, %c14_i32 : i32
    %86 = arith.index_cast %85 : i32 to index
    %87 = memref.load %arg1[%86] : memref<16xi32, #tpu.memory_space<smem>>
    %88 = arith.index_cast %87 : i32 to index
    %c0_28 = arith.constant 0 : index
    %89 = vector.load %arg3[%88, %c0_28] : memref<64x128xf32, #tpu.memory_space<vmem>>, vector<1x128xf32>
    %c14 = arith.constant 14 : index
    %c0_29 = arith.constant 0 : index
    %90 = vector.load %arg12[%c14, %c0_29] : memref<16x128xf32, #tpu.memory_space<vmem>>, vector<1x128xf32>
    tpu.vector_store %arg12[%c14, %c0_29], %89 {strides = array<i32>} : memref<16x128xf32, #tpu.memory_space<vmem>>, vector<1x128xf32>,
    %c15_i32 = arith.constant 15 : i32
    %91 = arith.addi %0, %c15_i32 : i32
    %92 = arith.index_cast %91 : i32 to index
    %93 = memref.load %arg1[%92] : memref<16xi32, #tpu.memory_space<smem>>
    %94 = arith.index_cast %93 : i32 to index
    %c0_30 = arith.constant 0 : index
    %95 = vector.load %arg3[%94, %c0_30] : memref<64x128xf32, #tpu.memory_space<vmem>>, vector<1x128xf32>
    %c15 = arith.constant 15 : index
    %c0_31 = arith.constant 0 : index
    %96 = vector.load %arg12[%c15, %c0_31] : memref<16x128xf32, #tpu.memory_space<vmem>>, vector<1x128xf32>
    tpu.vector_store %arg12[%c15, %c0_31], %95 {strides = array<i32>} : memref<16x128xf32, #tpu.memory_space<vmem>>, vector<1x128xf32>,
    %c0_32 = arith.constant 0 : index
    %c0_33 = arith.constant 0 : index
    %97 = vector.load %arg12[%c0_32, %c0_33] : memref<16x128xf32, #tpu.memory_space<vmem>>, vector<16x128xf32>
    %c0_34 = arith.constant 0 : index
    %c0_35 = arith.constant 0 : index
    %98 = vector.load %arg4[%c0_34, %c0_35] : memref<128x128xf32, #tpu.memory_space<vmem>>, vector<128x128xf32>
    %cst = arith.constant dense<0.000000e+00> : vector<16x128xf32>
    %99 = tpu.matmul %97, %98, %cst {dimension_numbers = #tpu.dot_dimension_numbers<[1], [0], [0], [1], [0, 0, 1, 1], [], []>} : vector<16x128xf32>, vector<128x128xf32>, vector<16x128xf32> -> vector<16x128xf32>
    %c0_36 = arith.constant 0 : index
    %c0_37 = arith.constant 0 : index
    %100 = vector.load %arg2[%c0_36, %c0_37] : memref<32x128xf32, #tpu.memory_space<vmem>>, vector<32x128xf32>
    %c0_38 = arith.constant 0 : index
    %c0_39 = arith.constant 0 : index
    %101 = vector.load %arg5[%c0_38, %c0_39] : memref<128x128xf32, #tpu.memory_space<vmem>>, vector<128x128xf32>
    %cst_40 = arith.constant dense<0.000000e+00> : vector<32x128xf32>
    %102 = tpu.matmul %100, %101, %cst_40 {dimension_numbers = #tpu.dot_dimension_numbers<[1], [0], [0], [1], [0, 0, 1, 1], [], []>} : vector<32x128xf32>, vector<128x128xf32>, vector<32x128xf32> -> vector<32x128xf32>
    %c0_41 = arith.constant 0 : index
    %c0_42 = arith.constant 0 : index
    %103 = vector.load %arg6[%c0_41, %c0_42] : memref<1x128xf32, #tpu.memory_space<vmem>>, vector<1x128xf32>
    %104 = vector.broadcast %103 : vector<1x128xf32> to vector<32x128xf32>
    %105 = arith.addf %102, %104 : vector<32x128xf32>
    %c0_43 = arith.constant 0 : index
    %c0_44 = arith.constant 0 : index
    %106 = vector.load %arg2[%c0_43, %c0_44] : memref<32x128xf32, #tpu.memory_space<vmem>>, vector<32x128xf32>
    %c0_45 = arith.constant 0 : index
    %c0_46 = arith.constant 0 : index
    %107 = vector.load %arg7[%c0_45, %c0_46] : memref<128x128xf32, #tpu.memory_space<vmem>>, vector<128x128xf32>
    %cst_47 = arith.constant dense<0.000000e+00> : vector<32x128xf32>
    %108 = tpu.matmul %106, %107, %cst_47 {dimension_numbers = #tpu.dot_dimension_numbers<[1], [0], [0], [1], [0, 0, 1, 1], [], []>} : vector<32x128xf32>, vector<128x128xf32>, vector<32x128xf32> -> vector<32x128xf32>
    %c0_48 = arith.constant 0 : index
    %c0_49 = arith.constant 0 : index
    %109 = vector.load %arg8[%c0_48, %c0_49] : memref<1x128xf32, #tpu.memory_space<vmem>>, vector<1x128xf32>
    %110 = vector.broadcast %109 : vector<1x128xf32> to vector<32x128xf32>
    %111 = arith.addf %108, %110 : vector<32x128xf32>
    %112 = vector.extract_strided_slice %99 {offsets = [0, 0], sizes = [8, 128], strides = [1, 1]} : vector<16x128xf32> to vector<8x128xf32>
    %113 = vector.extract_strided_slice %105 {offsets = [0, 0], sizes = [16, 128], strides = [1, 1]} : vector<32x128xf32> to vector<16x128xf32>
    %114 = vector.extract_strided_slice %111 {offsets = [0, 0], sizes = [16, 128], strides = [1, 1]} : vector<32x128xf32> to vector<16x128xf32>
    %cst_50 = arith.constant dense<0.000000e+00> : vector<8x16xf32>
    %115 = tpu.matmul %112, %113, %cst_50 {dimension_numbers = #tpu.dot_dimension_numbers<[1], [1], [0], [0], [0, 0, 1, 0], [], []>} : vector<8x128xf32>, vector<16x128xf32>, vector<8x16xf32> -> vector<8x16xf32>
    %cst_51 = arith.constant dense<0xFF800000> : vector<8xf32>
    %116 = vector.multi_reduction <maximumf>, %115, %cst_51 [1] : vector<8x16xf32> to vector<8xf32>
    %117 = vector.shape_cast %116 : vector<8xf32> to vector<8x1xf32>
    %118 = vector.broadcast %117 : vector<8x1xf32> to vector<8x16xf32>
    %119 = arith.subf %115, %118 : vector<8x16xf32>
    %120 = math.exp %119 : vector<8x16xf32>
    %cst_52 = arith.constant dense<0.000000e+00> : vector<8xf32>
    %121 = vector.multi_reduction <add>, %120, %cst_52 [1] : vector<8x16xf32> to vector<8xf32>
    %122 = vector.shape_cast %121 : vector<8xf32> to vector<8x1xf32>
    %123 = vector.broadcast %122 : vector<8x1xf32> to vector<8x16xf32>
    %124 = arith.divf %120, %123 : vector<8x16xf32>
    %cst_53 = arith.constant dense<0.000000e+00> : vector<8x128xf32>
    %125 = tpu.matmul %124, %114, %cst_53 {dimension_numbers = #tpu.dot_dimension_numbers<[1], [0], [0], [1], [0, 0, 1, 1], [], []>} : vector<8x16xf32>, vector<16x128xf32>, vector<8x128xf32> -> vector<8x128xf32>
    %126 = vector.extract_strided_slice %97 {offsets = [0, 0], sizes = [8, 128], strides = [1, 1]} : vector<16x128xf32> to vector<8x128xf32>
    %127 = arith.addf %126, %125 : vector<8x128xf32>
    %128 = vector.extract_strided_slice %99 {offsets = [8, 0], sizes = [8, 128], strides = [1, 1]} : vector<16x128xf32> to vector<8x128xf32>
    %129 = vector.extract_strided_slice %105 {offsets = [16, 0], sizes = [16, 128], strides = [1, 1]} : vector<32x128xf32> to vector<16x128xf32>
    %130 = vector.extract_strided_slice %111 {offsets = [16, 0], sizes = [16, 128], strides = [1, 1]} : vector<32x128xf32> to vector<16x128xf32>
    %cst_54 = arith.constant dense<0.000000e+00> : vector<8x16xf32>
    %131 = tpu.matmul %128, %129, %cst_54 {dimension_numbers = #tpu.dot_dimension_numbers<[1], [1], [0], [0], [0, 0, 1, 0], [], []>} : vector<8x128xf32>, vector<16x128xf32>, vector<8x16xf32> -> vector<8x16xf32>
    %cst_55 = arith.constant dense<0xFF800000> : vector<8xf32>
    %132 = vector.multi_reduction <maximumf>, %131, %cst_55 [1] : vector<8x16xf32> to vector<8xf32>
    %133 = vector.shape_cast %132 : vector<8xf32> to vector<8x1xf32>
    %134 = vector.broadcast %133 : vector<8x1xf32> to vector<8x16xf32>
    %135 = arith.subf %131, %134 : vector<8x16xf32>
    %136 = math.exp %135 : vector<8x16xf32>
    %cst_56 = arith.constant dense<0.000000e+00> : vector<8xf32>
    %137 = vector.multi_reduction <add>, %136, %cst_56 [1] : vector<8x16xf32> to vector<8xf32>
    %138 = vector.shape_cast %137 : vector<8xf32> to vector<8x1xf32>
    %139 = vector.broadcast %138 : vector<8x1xf32> to vector<8x16xf32>
    %140 = arith.divf %136, %139 : vector<8x16xf32>
    %cst_57 = arith.constant dense<0.000000e+00> : vector<8x128xf32>
    %141 = tpu.matmul %140, %130, %cst_57 {dimension_numbers = #tpu.dot_dimension_numbers<[1], [0], [0], [1], [0, 0, 1, 1], [], []>} : vector<8x16xf32>, vector<16x128xf32>, vector<8x128xf32> -> vector<8x128xf32>
    %142 = vector.extract_strided_slice %97 {offsets = [8, 0], sizes = [8, 128], strides = [1, 1]} : vector<16x128xf32> to vector<8x128xf32>
    %143 = arith.addf %142, %141 : vector<8x128xf32>
    %144 = tpu.concatenate %127, %143 in 0 : vector<8x128xf32>, vector<8x128xf32> -> vector<16x128xf32>
    %cst_58 = arith.constant dense<0.000000e+00> : vector<16xf32>
    %145 = vector.multi_reduction <add>, %144, %cst_58 [1] : vector<16x128xf32> to vector<16xf32>
    %146 = vector.shape_cast %145 : vector<16xf32> to vector<16x1xf32>
    %cst_59 = arith.constant 3.125000e-02 : f32
    %147 = vector.broadcast %cst_59 : f32 to vector<16x1xf32>
    %148 = arith.mulf %146, %147 : vector<16x1xf32>
    %149 = tpu.iota {dimensions = array<i32: 1>} : vector<16x128xi32>
    %c32_i32 = arith.constant 32 : i32
    %150 = vector.broadcast %c32_i32 : i32 to vector<16x128xi32>
    %151 = arith.cmpi slt, %149, %150 : vector<16x128xi32>
    %152 = vector.broadcast %148 : vector<16x1xf32> to vector<16x128xf32>
    %153 = arith.subf %144, %152 : vector<16x128xf32>
    %cst_60 = arith.constant 0.000000e+00 : f32
    %154 = vector.broadcast %cst_60 : f32 to vector<16x128xf32>
    %155 = arith.select %151, %153, %154 : vector<16x128xi1>, vector<16x128xf32>
    %156 = arith.mulf %155, %155 : vector<16x128xf32>
    %cst_61 = arith.constant dense<0.000000e+00> : vector<16xf32>
    %157 = vector.multi_reduction <add>, %156, %cst_61 [1] : vector<16x128xf32> to vector<16xf32>
    %158 = vector.shape_cast %157 : vector<16xf32> to vector<16x1xf32>
    %cst_62 = arith.constant 3.125000e-02 : f32
    %159 = vector.broadcast %cst_62 : f32 to vector<16x1xf32>
    %160 = arith.mulf %158, %159 : vector<16x1xf32>
    %cst_63 = arith.constant 9.99999974E-6 : f32
    %161 = vector.broadcast %cst_63 : f32 to vector<16x1xf32>
    %162 = arith.addf %160, %161 : vector<16x1xf32>
    %163 = math.rsqrt %162 : vector<16x1xf32>
    %164 = vector.broadcast %163 : vector<16x1xf32> to vector<16x128xf32>
    %165 = arith.mulf %155, %164 : vector<16x128xf32>
    %c0_64 = arith.constant 0 : index
    %c0_65 = arith.constant 0 : index
    %166 = vector.load %arg9[%c0_64, %c0_65] : memref<128x128xf32, #tpu.memory_space<vmem>>, vector<128x128xf32>
    %cst_66 = arith.constant dense<0.000000e+00> : vector<16x128xf32>
    %167 = tpu.matmul %165, %166, %cst_66 {dimension_numbers = #tpu.dot_dimension_numbers<[1], [0], [0], [1], [0, 0, 1, 1], [], []>} : vector<16x128xf32>, vector<128x128xf32>, vector<16x128xf32> -> vector<16x128xf32>
    %c0_67 = arith.constant 0 : index
    %c0_68 = arith.constant 0 : index
    %168 = vector.load %arg10[%c0_67, %c0_68] : memref<1x128xf32, #tpu.memory_space<vmem>>, vector<1x128xf32>
    %169 = vector.broadcast %168 : vector<1x128xf32> to vector<16x128xf32>
    %170 = arith.addf %167, %169 : vector<16x128xf32>
    %c0_69 = arith.constant 0 : index
    %c0_70 = arith.constant 0 : index
    %171 = vector.load %arg11[%c0_69, %c0_70] : memref<16x128xf32, #tpu.memory_space<vmem>>, vector<16x128xf32>
    tpu.vector_store %arg11[%c0_69, %c0_70], %170 {strides = array<i32>} : memref<16x128xf32, #tpu.memory_space<vmem>>, vector<16x128xf32>,
    return
  }
  func.func @transform_0(%arg0: i32, %arg1: memref<16xi32, #tpu.memory_space<smem>>) -> (i32, i32) {
    %c0_i32 = arith.constant 0 : i32
    %c0_i32_0 = arith.constant 0 : i32
    return %arg0, %c0_i32 : i32, i32
  }
  func.func @transform_1(%arg0: i32, %arg1: memref<16xi32, #tpu.memory_space<smem>>) -> (i32, i32) {
    %c0_i32 = arith.constant 0 : i32
    %c0_i32_0 = arith.constant 0 : i32
    %c0_i32_1 = arith.constant 0 : i32
    return %c0_i32, %c0_i32_0 : i32, i32
  }
  func.func @transform_2(%arg0: i32, %arg1: memref<16xi32, #tpu.memory_space<smem>>) -> (i32, i32) {
    %c0_i32 = arith.constant 0 : i32
    %c0_i32_0 = arith.constant 0 : i32
    %c0_i32_1 = arith.constant 0 : i32
    return %c0_i32, %c0_i32_0 : i32, i32
  }
  func.func @transform_3(%arg0: i32, %arg1: memref<16xi32, #tpu.memory_space<smem>>) -> (i32, i32) {
    %c0_i32 = arith.constant 0 : i32
    %c0_i32_0 = arith.constant 0 : i32
    %c0_i32_1 = arith.constant 0 : i32
    return %c0_i32, %c0_i32_0 : i32, i32
  }
  func.func @transform_4(%arg0: i32, %arg1: memref<16xi32, #tpu.memory_space<smem>>) -> (i32, i32) {
    %c0_i32 = arith.constant 0 : i32
    %c0_i32_0 = arith.constant 0 : i32
    %c0_i32_1 = arith.constant 0 : i32
    return %c0_i32, %c0_i32_0 : i32, i32
  }
  func.func @transform_5(%arg0: i32, %arg1: memref<16xi32, #tpu.memory_space<smem>>) -> (i32, i32) {
    %c0_i32 = arith.constant 0 : i32
    %c0_i32_0 = arith.constant 0 : i32
    %c0_i32_1 = arith.constant 0 : i32
    return %c0_i32, %c0_i32_0 : i32, i32
  }
  func.func @transform_6(%arg0: i32, %arg1: memref<16xi32, #tpu.memory_space<smem>>) -> (i32, i32) {
    %c0_i32 = arith.constant 0 : i32
    %c0_i32_0 = arith.constant 0 : i32
    %c0_i32_1 = arith.constant 0 : i32
    return %c0_i32, %c0_i32_0 : i32, i32
  }
  func.func @transform_7(%arg0: i32, %arg1: memref<16xi32, #tpu.memory_space<smem>>) -> (i32, i32) {
    %c0_i32 = arith.constant 0 : i32
    %c0_i32_0 = arith.constant 0 : i32
    %c0_i32_1 = arith.constant 0 : i32
    return %c0_i32, %c0_i32_0 : i32, i32
  }
  func.func @transform_8(%arg0: i32, %arg1: memref<16xi32, #tpu.memory_space<smem>>) -> (i32, i32) {
    %c0_i32 = arith.constant 0 : i32
    %c0_i32_0 = arith.constant 0 : i32
    %c0_i32_1 = arith.constant 0 : i32
    return %c0_i32, %c0_i32_0 : i32, i32
  }
  func.func @transform_9(%arg0: i32, %arg1: memref<16xi32, #tpu.memory_space<smem>>) -> (i32, i32) {
    %c0_i32 = arith.constant 0 : i32
    %c0_i32_0 = arith.constant 0 : i32
    return %arg0, %c0_i32 : i32, i32
  }
}

</mosaic_0001>

<bundles_post_ra>
// kernel: tpu_custom_call.1
= control target key start
LH: loop header
LB: loop body
LE: loop exit
PB: predicated region body
PF: predicated region fallthrough
CT: control target
= control target key end

     0   :  { %s874_s16 = smov [#allocation4]   ;;  %s1047_s0 = inlined_call_operand.hbm [shape: s32[16], index: 0, kind: input, shape index: {}]   ;;  %s1048_s1 = inlined_call_operand.hbm [shape: f32[32,128], index: 1, kind: input, shape index: {}]   ;;  %s1049_s2 = inlined_call_operand.hbm [shape: f32[64,128], index: 2, kind: input, shape index: {}]   ;;  %s1050_s3 = inlined_call_operand.hbm [shape: f32[128,128], index: 3, kind: input, shape index: {}]   ;;  %s1051_s4 = inlined_call_operand.hbm [shape: f32[128,128], index: 4, kind: input, shape index: {}]   ;;  %s1052_s5 = inlined_call_operand.vmem [shape: f32[1,128], index: 5, kind: input, shape index: {}]   ;;  %s1053_s6 = inlined_call_operand.hbm [shape: f32[128,128], index: 6, kind: input, shape index: {}]   ;;  %s1054_s7 = inlined_call_operand.vmem [shape: f32[1,128], index: 7, kind: input, shape index: {}]   ;;  %s1055_s8 = inlined_call_operand.hbm [shape: f32[128,128], index: 8, kind: input, shape index: {}]   ;;  %s1056_s9 = inlined_call_operand.vmem [shape: f32[1,128], index: 9, kind: input, shape index: {}]   ;;  %s1057_s10 = inlined_call_operand.hbm [shape: f32[16,128], index: 10, kind: output, shape index: {}]  }
   0x1   :  { %s16_s15 = sshll.u32 %s1047_s0, 4  ;;  %s17_s15 = int_to_ptr.hbm [resolvable:$true] %s16_s15 }
   0x2   :  { %19 = dma.hbm_to_smem %s17_s15, 16, %s874_s16, [#allocation3] }
   0x3   :  { %862 = dma.done.wait [#allocation3], 16 }
   0x4   :  { %863 = vsyncadd [#allocation3], 4294967280 }
   0x5   :  { %22 = sfence }
   0x6   :  { %23 = vsyncpa [#allocation6], 0 }
   0x7   :  { %24 = vsyncpa [#allocation9], 0 }
   0x8   :  { %25 = vsyncpa [#allocation12], 0 }
   0x9   :  { %26 = vsyncpa [#allocation15], 0 }
   0xa   :  { %27 = vsyncpa [#allocation7], 0  ;;  %s45_s19 = sshll.u32 %s1049_s2, 4  ;;  %s875_s20 = smov [#allocation8]   ;;  %s46_s19 = int_to_ptr.hbm [resolvable:$true] %s45_s19 }
   0xb   :  { %s47_s21 = sshll.u32 %s875_s20, 4  ;;  %s71_s23 = sshll.u32 %s1051_s4, 4  ;;  %s48_s21 = int_to_ptr.vmem [resolvable:$true] %s47_s21  ;;  %s72_s23 = int_to_ptr.hbm [resolvable:$true] %s71_s23 }
   0xc   :  { %s876_s24 = smov 128   ;;  %s877_s25 = smov 8  }
   0xd   :  { %53 = dma.hbm_to_vmem [thread:$0]  %s46_s19, 1024, %s48_s21, [#allocation9], %s876_s24, %s876_s24, %s877_s25  }
   0xe   :  { %s878_s26 = smov [#allocation11]   ;;  %s32_s2 = sshll.u32 %s1048_s1, 4  ;;  %s33_s2 = int_to_ptr.hbm [resolvable:$true] %s32_s2 }
   0xf   :  { %s73_s27 = sshll.u32 %s878_s26, 4  ;;  %s58_s11 = sshll.u32 %s1050_s3, 4  ;;  %s74_s27 = int_to_ptr.vmem [resolvable:$true] %s73_s27  ;;  %s59_s11 = int_to_ptr.hbm [resolvable:$true] %s58_s11 }
  0x10   :  { %79 = dma.hbm_to_vmem [thread:$0]  %s72_s23, 2048, %s74_s27, [#allocation12], %s876_s24, %s876_s24, %s877_s25  }
  0x11   :  { %s879_s12 = smov [#allocation5]   ;;  %s880_s14 = smov [#allocation10]  }
  0x12   :  { %s34_s13 = sshll.u32 %s879_s12, 4  ;;  %s60_s1 = sshll.u32 %s880_s14, 4  ;;  %s35_s13 = int_to_ptr.vmem [resolvable:$true] %s34_s13  ;;  %s61_s1 = int_to_ptr.vmem [resolvable:$true] %s60_s1 }
  0x13   :  { %40 = dma.hbm_to_vmem [thread:$0]  %s33_s2, 512, %s35_s13, [#allocation6], %s876_s24, %s876_s24, %s877_s25  }
  0x14   :  { %s86_s17 = sshll.u32 %s1053_s6, 4  ;;  %s101_s19 = sshll.u32 %s1055_s8, 4  ;;  %s87_s17 = int_to_ptr.hbm [resolvable:$true] %s86_s17  ;;  %s102_s19 = int_to_ptr.hbm [resolvable:$true] %s101_s19 }
  0x15   :  { %66 = dma.hbm_to_vmem [thread:$0]  %s59_s11, 2048, %s61_s1, [#allocation9], %s876_s24, %s876_s24, %s877_s25  }
  0x16   :  { %s881_s20 = smov [#allocation13]   ;;  %s882_s0 = smov [#allocation14]  }
  0x17   :  { %s88_s21 = sshll.u32 %s881_s20, 4  ;;  %s103_s6 = sshll.u32 %s882_s0, 4  ;;  %s89_s21 = int_to_ptr.vmem [resolvable:$true] %s88_s21  ;;  %s104_s6 = int_to_ptr.vmem [resolvable:$true] %s103_s6 }
  0x18   :  { %94 = dma.hbm_to_vmem [thread:$0]  %s87_s17, 2048, %s89_s21, [#allocation12], %s876_s24, %s876_s24, %s877_s25  }
  0x19   :  { %109 = dma.hbm_to_vmem [thread:$0]  %s102_s19, 2048, %s104_s6, [#allocation15], %s876_s24, %s876_s24, %s877_s25  }
  0x1a   :  { %864 = dma.done.wait [#allocation6], 512  }
  0x1b   :  { %865 = vsyncadd [#allocation6], 4294966784 }
  0x1c   :  { %866 = dma.done.wait [#allocation9], 3072  }
  0x1d   :  { %867 = vsyncadd [#allocation9], 4294964224 }
  0x1e   :  { %868 = dma.done.wait [#allocation12], 4096  }
  0x1f   :  { %869 = vsyncadd [#allocation12], 4294963200 }
  0x20   :  { %870 = dma.done.wait [#allocation15], 2048  }
  0x21   :  { %871 = vsyncadd [#allocation15], 4294965248  ;;  %s978_s8 = sld [smem:[#allocation4]]  ;;  %v276_v0 = vld [vmem:[#allocation11 + $0x78] sm:$0xff]  ;;  %v275_v1 = vld [vmem:[#allocation11 + $0x70] sm:$0xff]  ;;  %vm379_vm0 = vcmask 130048  }
  0x22   :  { %s980_s22 = sld [smem:[#allocation4 + $0x1]]  ;;  %281 = vmatpush.msra.mxu1 %v276_v0  ;;  %v274_v2 = vld [vmem:[#allocation11 + $0x68] sm:$0xff]  ;;  %v233_v3 = vld [vmem:[#allocation10 + $0x78] sm:$0xff]  ;;  %v232_v4 = vld [vmem:[#allocation10 + $0x70] sm:$0xff] }
  0x23   :  { %s982_s23 = sld [smem:[#allocation4 + $0x2]]  ;;  %v273_v5 = vld [vmem:[#allocation11 + $0x60] sm:$0xff]  ;;  %234 = vmatpush.msra.mxu0 %v233_v3  ;;  %v231_v6 = vld [vmem:[#allocation10 + $0x68] sm:$0xff]  ;;  %v272_v7 = vld [vmem:[#allocation11 + $0x58] sm:$0xff] }
  0x24   :  { %s984_s26 = sld [smem:[#allocation4 + $0x3]]  ;;  %282 = vmatpush.msra.mxu1 %v275_v1  ;;  %v230_v8 = vld [vmem:[#allocation10 + $0x60] sm:$0xff]  ;;  %v271_v9 = vld [vmem:[#allocation11 + $0x50] sm:$0xff]  ;;  %v229_v10 = vld [vmem:[#allocation10 + $0x58] sm:$0xff] }
  0x25   :  { %s986_s27 = sld [smem:[#allocation4 + $0x4]]  ;;  %235 = vmatpush.msra.mxu0 %v232_v4  ;;  %v270_v11 = vld [vmem:[#allocation11 + $0x48] sm:$0xff]  ;;  %v269_v12 = vld [vmem:[#allocation11 + $0x40] sm:$0xff]  ;;  %v228_v13 = vld [vmem:[#allocation10 + $0x50] sm:$0xff] }
  0x26   :  { %s988_s28 = sld [smem:[#allocation4 + $0x5]]  ;;  %283 = vmatpush.msra.mxu1 %v274_v2  ;;  %v268_v16 = vld [vmem:[#allocation11 + $0x38] sm:$0xff]  ;;  %v227_v19 = vld [vmem:[#allocation10 + $0x48] sm:$0xff]  ;;  %v226_v20 = vld [vmem:[#allocation10 + $0x40] sm:$0xff] }
  0x27   :  { %s990_s29 = sld [smem:[#allocation4 + $0x6]]  ;;  %236 = vmatpush.msra.mxu0 %v231_v6  ;;  %s138_s4 = scalar_lea.vmem [#allocation8], %s978_s8  ;;  %v267_v22 = vld [vmem:[#allocation11 + $0x30] sm:$0xff]  ;;  %v225_v26 = vld [vmem:[#allocation10 + $0x38] sm:$0xff]  ;;  %v266_v27 = vld [vmem:[#allocation11 + $0x28] sm:$0xff] }
  0x28   :  { %s992_s2 = sld [smem:[#allocation4 + $0x7]]  ;;  %284 = vmatpush.msra.mxu1 %v273_v5  ;;  %v139_v14 = vld [vmem:[%s138_s4] sm:$0x1]  ;;  %s143_s30 = scalar_lea.vmem [#allocation8], %s980_s22  ;;  %v265_v29 = vld [vmem:[#allocation11 + $0x20] sm:$0xff]  ;;  %v223_v30 = vld [vmem:[#allocation10 + $0x28] sm:$0xff] }
  0x29   :  { %237 = vmatpush.msra.mxu0 %v230_v8  ;;  %v144_v15 = vld [vmem:[%s143_s30] sm:$0x1]  ;;  %140 = vst [vmem:[#allocation2] sm:$0x1] %v139_v14  ;;  %s148_s11 = scalar_lea.vmem [#allocation8], %s982_s23  ;;  %v264_v31 = vld [vmem:[#allocation11 + $0x18] sm:$0xff] }
  0x2a   :  { %285 = vmatpush.msra.mxu1 %v272_v7  ;;  %v149_v17 = vld [vmem:[%s148_s11] sm:$0x1]  ;;  %s153_s12 = scalar_lea.vmem [#allocation8], %s984_s26  ;;  %145 = vst [vmem:[#allocation2 + $0x1] sm:$0x1] %v144_v15  ;;  %v222_v32 = vld [vmem:[#allocation10 + $0x20] sm:$0xff] }
  0x2b   :  { %238 = vmatpush.msra.mxu0 %v229_v10  ;;  %v154_v18 = vld [vmem:[%s153_s12] sm:$0x1]  ;;  %s158_s13 = scalar_lea.vmem [#allocation8], %s986_s27  ;;  %150 = vst [vmem:[#allocation2 + $0x2] sm:$0x1] %v149_v17  ;;  %v221_v34 = vld [vmem:[#allocation10 + $0x18] sm:$0xff] }
  0x2c   :  { %286 = vmatpush.msra.mxu1 %v271_v9  ;;  %v159_v21 = vld [vmem:[%s158_s13] sm:$0x1]  ;;  %s163_s14 = scalar_lea.vmem [#allocation8], %s988_s28  ;;  %155 = vst [vmem:[#allocation2 + $0x3] sm:$0x1] %v154_v18  ;;  %v262_v35 = vld [vmem:[#allocation11 + $0x8] sm:$0xff] }
  0x2d   :  { %239 = vmatpush.msra.mxu0 %v228_v13  ;;  %v164_v23 = vld [vmem:[%s163_s14] sm:$0x1]  ;;  %s168_s1 = scalar_lea.vmem [#allocation8], %s990_s29  ;;  %160 = vst [vmem:[#allocation2 + $0x4] sm:$0x1] %v159_v21  ;;  %v261_v37 = vld [vmem:[#allocation11] sm:$0xff] }
  0x2e   :  { %287 = vmatpush.msra.mxu1 %v270_v11  ;;  %v169_v24 = vld [vmem:[%s168_s1] sm:$0x1]  ;;  %s173_s15 = scalar_lea.vmem [#allocation8], %s992_s2  ;;  %165 = vst [vmem:[#allocation2 + $0x5] sm:$0x1] %v164_v23  ;;  %v257_v38 = vld [vmem:[#allocation5] sm:$0xff] }
  0x2f   :  { %v174_v25 = vld [vmem:[%s173_s15] sm:$0x1]  ;;  %240 = vmatpush.msra.mxu0 %v227_v19  ;;  %170 = vst [vmem:[#allocation2 + $0x6] sm:$0x1] %v169_v24  ;;  %v219_v39 = vld [vmem:[#allocation10 + $0x8] sm:$0xff]  ;;  %v218_v40 = vld [vmem:[#allocation10] sm:$0xff] }
  0x30   :  { %288 = vmatpush.msra.mxu1 %v269_v12  ;;  %v224_v28 = vld [vmem:[#allocation10 + $0x30] sm:$0xff]  ;;  %175 = vst [vmem:[#allocation2 + $0x7] sm:$0x1] %v174_v25  ;;  %v258_v42 = vld [vmem:[#allocation5 + $0x8] sm:$0xff]  ;;  %v325_v49 = vld [vmem:[#allocation13 + $0x78] sm:$0xff]  ;;  %s632_s3 = sld [smem:[#allocation4 + $0x9]] }
  0x31   :  { %241 = vmatpush.msra.mxu0 %v226_v20  ;;  %v263_v33 = vld [vmem:[#allocation11 + $0x10] sm:$0xff]  ;;  %330 = vmatpush.msra.mxu2 %v325_v49  ;;  %v323_v51 = vld [vmem:[#allocation13 + $0x68] sm:$0xff]  ;;  %v322_v52 = vld [vmem:[#allocation13 + $0x60] sm:$0xff]  ;;  %s633_s18 = sld [smem:[#allocation4 + $0xa]]  ;;  %s883_s12 = smov [#allocation16]  }
  0x32   :  { %289 = vmatpush.msra.mxu1 %v268_v16  ;;  %v220_v36 = vld [vmem:[#allocation10 + $0x10] sm:$0xff]  ;;  %v321_v53 = vld [vmem:[#allocation13 + $0x58] sm:$0xff]  ;;  %v319_v56 = vld [vmem:[#allocation13 + $0x48] sm:$0xff]  ;;  %s634_s19 = sld [smem:[#allocation4 + $0xb]]  ;;  %s590_s13 = sshll.u32 %s883_s12, 4  ;;  %s591_s13 = int_to_ptr.vmem [resolvable:$true] %s590_s13 }
  0x33   :  { %242 = vmatpush.msra.mxu0 %v225_v26  ;;  %v1008_v44 = vld [vmem:[%s1052_s5] ss:$0 sm:$0xff]  ;;  %v318_v57 = vld [vmem:[#allocation13 + $0x40] sm:$0xff]  ;;  %v317_v58 = vld [vmem:[#allocation13 + $0x38] sm:$0xff]  ;;  %s631_s5 = sld [smem:[#allocation4 + $0x8]]  ;;  %s592_s15 = sshll.u32 %s1057_s10, 4  ;;  %s593_s15 = int_to_ptr.hbm [resolvable:$true] %s592_s15 }
  0x34   :  { %290 = vmatpush.msra.mxu1 %v267_v22  ;;  %v324_v50 = vld [vmem:[#allocation13 + $0x70] sm:$0xff]  ;;  %v315_v60 = vld [vmem:[#allocation13 + $0x28] sm:$0xff]  ;;  %v314_v61 = vld [vmem:[#allocation13 + $0x20] sm:$0xff]  ;;  %s635_s20 = sld [smem:[#allocation4 + $0xc]] }
  0x35   :  { %243 = vmatpush.msra.mxu0 %v224_v28  ;;  %331 = vmatpush.msra.mxu2 %v324_v50  ;;  %v320_v54 = vld [vmem:[#allocation13 + $0x50] sm:$0xff]  ;;  %v313_v62 = vld [vmem:[#allocation13 + $0x18] sm:$0xff]  ;;  %v311_v0 = vld [vmem:[#allocation13 + $0x8] sm:$0xff]  ;;  %s636_s21 = sld [smem:[#allocation4 + $0xd]] }
  0x36   :  { %291 = vmatpush.msra.mxu1 %v266_v27  ;;  %v259_v55 = vld [vmem:[#allocation5 + $0x10] sm:$0xff]  ;;  %v310_v1 = vld [vmem:[#allocation13] sm:$0xff]  ;;  %v260_v4 = vld [vmem:[#allocation5 + $0x18] sm:$0xff]  ;;  %s637_s0 = sld [smem:[#allocation4 + $0xe]]  ;;  %s183_s22 = scalar_lea.vmem [#allocation8], %s632_s3 }
  0x37   :  { %244 = vmatpush.msra.mxu0 %v223_v30  ;;  %v1002_v41 = vld [vmem:[#allocation2] sm:$0xff]  ;;  %332 = vmatpush.msra.mxu2 %v323_v51  ;;  %s638_s6 = sld [smem:[#allocation4 + $0xf]]  ;;  %s188_s23 = scalar_lea.vmem [#allocation8], %s633_s18 }
  0x38   :  { %292 = vmatpush.msra.mxu1 %v265_v29  ;;  %v316_v59 = vld [vmem:[#allocation13 + $0x30] sm:$0xff]  ;;  %s193_s26 = scalar_lea.vmem [#allocation8], %s634_s19 }
  0x39   :  { %245 = vmatpush.msra.mxu0 %v222_v32  ;;  %333 = vmatpush.msra.mxu2 %v322_v52  ;;  %v312_v63 = vld [vmem:[#allocation13 + $0x10] sm:$0xff]  ;;  %s178_s8 = scalar_lea.vmem [#allocation8], %s631_s5 }
  0x3a   :  { %293 = vmatpush.msra.mxu1 %v264_v31  ;;  %v179_v5 = vld [vmem:[%s178_s8] sm:$0x1]  ;;  %s198_s27 = scalar_lea.vmem [#allocation8], %s635_s20 }
  0x3b   :  { %246 = vmatpush.msra.mxu0 %v221_v34  ;;  %334 = vmatpush.msra.mxu2 %v321_v53  ;;  %v184_v6 = vld [vmem:[%s183_s22] sm:$0x1]  ;;  %180 = vst [vmem:[#allocation2 + $0x8] sm:$0x1] %v179_v5  ;;  %s203_s28 = scalar_lea.vmem [#allocation8], %s636_s21  ;;  %v556_v5 = vld [vmem:[#allocation14 + $0x78] sm:$0xff] }
  0x3c   :  { %294 = vmatpush.msra.mxu1 %v263_v33  ;;  %v189_v7 = vld [vmem:[%s188_s23] sm:$0x1]  ;;  %185 = vst [vmem:[#allocation2 + $0x9] sm:$0x1] %v184_v6  ;;  %s208_s29 = scalar_lea.vmem [#allocation8], %s637_s0 }
  0x3d   :  { %247 = vmatpush.msra.mxu0 %v220_v36  ;;  %335 = vmatpush.msra.mxu2 %v320_v54  ;;  %v194_v8 = vld [vmem:[%s193_s26] sm:$0x1]  ;;  %190 = vst [vmem:[#allocation2 + $0xa] sm:$0x1] %v189_v7  ;;  %s213_s2 = scalar_lea.vmem [#allocation8], %s638_s6  ;;  %v554_v7 = vld [vmem:[#allocation14 + $0x68] sm:$0xff] }
  0x3e   :  { %295 = vmatpush.msra.mxu1 %v262_v35  ;;  %v199_v9 = vld [vmem:[%s198_s27] sm:$0x1]  ;;  %195 = vst [vmem:[#allocation2 + $0xb] sm:$0x1] %v194_v8  ;;  %v553_v8 = vld [vmem:[#allocation14 + $0x60] sm:$0xff] }
  0x3f   :  { %248 = vmatpush.msra.mxu0 %v219_v39  ;;  %336 = vmatpush.msra.mxu2 %v319_v56  ;;  %v204_v10 = vld [vmem:[%s203_s28] sm:$0x1]  ;;  %200 = vst [vmem:[#allocation2 + $0xc] sm:$0x1] %v199_v9  ;;  %v502_v9 = vlaneseq }
  0x40   :  { %296 = vmatpush.msra.mxu1 %v261_v37  ;;  %v209_v11 = vld [vmem:[%s208_s29] sm:$0x1]  ;;  %205 = vst [vmem:[#allocation2 + $0xd] sm:$0x1] %v204_v10 }
  0x41   :  { %297 = vmatmul.f32.vlgmr.msra.gmra.mxu1 %v257_v38  ;;  %249 = vmatpush.msra.mxu0 %v218_v40  ;;  %v214_v12 = vld [vmem:[%s213_s2] sm:$0x1]  ;;  %210 = vst [vmem:[#allocation2 + $0xe] sm:$0x1] %v209_v11  ;;  %v503_v10 = vand.u32 127, %v502_v9 }
  0x42   :  { %250 = vmatmul.f32.vlgmr.msra.gmra.mxu0 %v1002_v41  ;;  %337 = vmatpush.msra.mxu2 %v318_v57  ;;  %215 = vst [vmem:[#allocation2 + $0xf] sm:$0x1] %v214_v12  ;;  %v668_v20 = vld [vmem:[%s1054_s7] ss:$0 sm:$0xff] }
  0x43   :  { %v555_v6 = vld [vmem:[#allocation14 + $0x70] sm:$0xff]  ;;  %561 = vmatpush.msrb.mxu0 %v556_v5  ;;  %vm504_vm9 = vcmp.lt.s32.totalorder %v503_v10, 32 }
  0x44   :  { %338 = vmatpush.msra.mxu2 %v317_v58 }
  0x45   :  { %562 = vmatpush.msrb.mxu0 %v555_v6 }
  0x46   :  { %339 = vmatpush.msra.mxu2 %v316_v59 }
  0x47   :  { %563 = vmatpush.msrb.mxu0 %v554_v7 }
  0x48   :  { %340 = vmatpush.msra.mxu2 %v315_v60 }
  0x49   :  { %300 = vmatmul.f32.gmra.mxu1 %v258_v42  ;;  %v1013_v13 = vld [vmem:[#allocation2 + $0x8] sm:$0xff]  ;;  %564 = vmatpush.msrb.mxu0 %v553_v8 }
  0x4a   :  { %341 = vmatpush.msra.mxu2 %v314_v61  ;;  %253 = vmatmul.f32.gmra.mxu0 %v1013_v13 }
  0x4c   :  { %342 = vmatpush.msra.mxu2 %v313_v62 }
  0x4e   :  { %343 = vmatpush.msra.mxu2 %v312_v63 }
  0x50   :  { %344 = vmatpush.msra.mxu2 %v311_v0 }
  0x51   :  { %303 = vmatmul.f32.gmra.mxu1 %v259_v55 }
  0x52   :  { %345 = vmatpush.msra.mxu2 %v310_v1 }
  0x53   :  { %346 = vmatmul.f32.vlgmr.msra.gmra.mxu2 %v257_v38 }
  0x59   :  { %306 = vmatmul.f32.gmra.mxu1 %v260_v4 }
  0x5b   :  { %349 = vmatmul.f32.gmra.mxu2 %v258_v42 }
  0x63   :  { %352 = vmatmul.f32.gmra.mxu2 %v259_v55 }
  0x6b   :  { %355 = vmatmul.f32.gmra.mxu2 %v260_v4 }
  0xbe   :  { %v298_v43 = vpop.f32.mrf.mxu1 }
  0xbf   :  { %v299_v47 = vadd.f32 %v1008_v44, %v298_v43  ;;  %v251_v48 = vpop.f32.mrf.mxu0 }
  0xc6   :  { %v301_v45 = vpop.f32.mrf.mxu1 }
  0xc7   :  { %v302_v46 = vadd.f32 %v1008_v44, %v301_v45  ;;  %v254_v40 = vpop.f32.mrf.mxu0 }
  0xc9   :  { %373 = vmatpush.xpose.msra.mxu3 %v302_v46 }
  0xcd   :  { %374 = vmatpush.xpose.msra.mxu3 %v299_v47 }
  0xce   :  { %v304_v24 = vpop.f32.mrf.mxu1 }
  0xcf   :  { %v305_v27 = vadd.f32 %v1008_v44, %v304_v24  ;;  %v548_v24 = vld [vmem:[#allocation14 + $0x38] sm:$0xff] }
  0xd0   :  { %375 = vmatmul.f32.vlgmr.msra.gmra.mxu3 %v251_v48 }
  0xd6   :  { %v347_v19 = vpop.f32.mrf.mxu2  ;;  %v307_v25 = vpop.f32.mrf.mxu1 }
  0xd7   :  { %v348_v22 = vadd.f32 %v668_v20, %v347_v19  ;;  %v308_v26 = vadd.f32 %v1008_v44, %v307_v25  ;;  %v547_v25 = vld [vmem:[#allocation14 + $0x30] sm:$0xff] }
  0xde   :  { %v350_v21 = vpop.f32.mrf.mxu2 }
  0xdf   :  { %v351_v23 = vadd.f32 %v668_v20, %v350_v21  ;;  %v551_v21 = vld [vmem:[#allocation14 + $0x50] sm:$0xff] }
  0xe1   :  { %421 = vmatpush.msrb.mxu3 %v351_v23  ;;  %v549_v23 = vld [vmem:[#allocation14 + $0x40] sm:$0xff] }
  0xe3   :  { %422 = vmatpush.msrb.mxu3 %v348_v22  ;;  %v550_v22 = vld [vmem:[#allocation14 + $0x48] sm:$0xff] }
  0xe5   :  { %442 = vmatpush.xpose.msra.mxu3 %v308_v26  ;;  %v546_v26 = vld [vmem:[#allocation14 + $0x28] sm:$0xff] }
  0xe6   :  { %v353_v45 = vpop.f32.mrf.mxu2 }
  0xe7   :  { %v354_v47 = vadd.f32 %v668_v20, %v353_v45 }
  0xe9   :  { %443 = vmatpush.xpose.msra.mxu3 %v305_v27  ;;  %v545_v27 = vld [vmem:[#allocation14 + $0x20] sm:$0xff] }
  0xee   :  { %v356_v46 = vpop.f32.mrf.mxu2 }
  0xef   :  { %v357_v48 = vadd.f32 %v668_v20, %v356_v46  ;;  %v552_v20 = vld [vmem:[#allocation14 + $0x58] sm:$0xff] }
  0xf0   :  { %565 = vmatpush.msrb.mxu0 %v552_v20 }
  0xf2   :  { %566 = vmatpush.msrb.mxu0 %v551_v21 }
  0xf4   :  { %567 = vmatpush.msrb.mxu0 %v550_v22 }
  0xf6   :  { %568 = vmatpush.msrb.mxu0 %v549_v23 }
  0xf8   :  { %569 = vmatpush.msrb.mxu0 %v548_v24 }
  0xfa   :  { %570 = vmatpush.msrb.mxu0 %v547_v25 }
  0xfc   :  { %571 = vmatpush.msrb.mxu0 %v546_v26 }
  0xfe   :  { %572 = vmatpush.msrb.mxu0 %v545_v27 }
 0x153   :  { %v376_v2 = vpop.f32.mrf.mxu3 }
 0x154   :  { %v380_v3 = vsel %vm379_vm0, %v376_v2, -inf }
 0x155   :  { %381 = vmax.xlane.f32.xlu0 %v380_v3 }
 0x1c8   :  { %v382_v14 = vpop.xlane.xlu0 %381 }
 0x1c9   :  { %v383_v15 = vsub.f32 %v376_v2, %v382_v14 }
 0x1cb   :  { %v384_v16 = vmul.f32 1.442695, %v383_v15 }
 0x1cd   :  { %670 = vpow2.f32 %v384_v16 }
 0x1d3   :  { %v671_v17 = vpop.eup %670 }
 0x1d4   :  { %v386_v18 = vsel %vm379_vm0, %v671_v17, 0.0 }
 0x1d5   :  { %387 = vadd.xlane.f32.xlu0 %v386_v18 }
 0x248   :  { %v388_v28 = vpop.xlane.xlu0 %387 }
 0x249   :  { %672 = vrcp.f32 %v388_v28  ;;  %v400_v32 = vand.u32 2147483648, %v388_v28  ;;  %v398_v34 = vand.u32 2147483647, %v388_v28  ;;  %vm394_vm2 = vweird.f32 %v388_v28 }
 0x24b   :  { %v401_v36 = vor.u32 1.1754944e-38, %v400_v32  ;;  %vm399_vm4 = vcmp.eq.f32.partialorder %v398_v34, 8.507059e+37 }
 0x24f   :  { %v673_v29 = vpop.eup %672 }
 0x250   :  { %v390_v30 = vmul.f32 %v673_v29, %v388_v28  ;;  %vm395_vm1 = vweird.f32 %v673_v29  ;;  %v544_v28 = vld [vmem:[#allocation14 + $0x18] sm:$0xff] }
 0x251   :  { %vm396_vm3 = vmor %vm394_vm2, %vm395_vm1  ;;  %573 = vmatpush.msrb.mxu0 %v544_v28 }
 0x252   :  { %v391_v31 = vsub.f32 1.0, %v390_v30  ;;  %v542_v30 = vld [vmem:[#allocation14 + $0x8] sm:$0xff] }
 0x254   :  { %v392_v33 = vmul.f32 %v673_v29, %v391_v31  ;;  %v541_v31 = vld [vmem:[#allocation14] sm:$0xff] }
 0x256   :  { %v393_v35 = vadd.f32 %v673_v29, %v392_v33 }
 0x258   :  { %v397_v37 = vsel %vm396_vm3, %v673_v29, %v393_v35  ;;  %v543_v29 = vld [vmem:[#allocation14 + $0x10] sm:$0xff] }
 0x259   :  { %v402_v38 = vsel %vm399_vm4, %v401_v36, %v397_v37  ;;  %574 = vmatpush.msrb.mxu0 %v543_v29 }
 0x25a   :  { %v403_v39 = vmul.f32 %v671_v17, %v402_v38 }
 0x25b   :  { %575 = vmatpush.msrb.mxu0 %v542_v30 }
 0x25c   :  { %639 = vmatmul.msk.f32.vlgmr.msrb.gmra.mxu3 %vm379_vm0, %v403_v39 }
 0x25d   :  { %489 = vmatpush.msrb.mxu3 %v357_v48  ;;  %576 = vmatpush.msrb.mxu0 %v541_v31 }
 0x25f   :  { %490 = vmatpush.msrb.mxu3 %v354_v47 }
 0x264   :  { %444 = vmatmul.f32.vlgmr.msra.gmra.mxu3 %v254_v40 }
 0x265   :  { %641 = vmatpush.msra.mxu3 %v556_v5 }
 0x267   :  { %642 = vmatpush.msra.mxu3 %v555_v6 }
 0x269   :  { %643 = vmatpush.msra.mxu3 %v554_v7 }
 0x26b   :  { %644 = vmatpush.msra.mxu3 %v553_v8 }
 0x26d   :  { %645 = vmatpush.msra.mxu3 %v552_v20 }
 0x26f   :  { %646 = vmatpush.msra.mxu3 %v551_v21 }
 0x271   :  { %647 = vmatpush.msra.mxu3 %v550_v22 }
 0x273   :  { %648 = vmatpush.msra.mxu3 %v549_v23 }
 0x275   :  { %649 = vmatpush.msra.mxu3 %v548_v24 }
 0x277   :  { %650 = vmatpush.msra.mxu3 %v547_v25 }
 0x279   :  { %651 = vmatpush.msra.mxu3 %v546_v26 }
 0x27b   :  { %652 = vmatpush.msra.mxu3 %v545_v27 }
 0x27d   :  { %653 = vmatpush.msra.mxu3 %v544_v28 }
 0x27f   :  { %654 = vmatpush.msra.mxu3 %v543_v29 }
 0x281   :  { %655 = vmatpush.msra.mxu3 %v542_v30 }
 0x283   :  { %656 = vmatpush.msra.mxu3 %v541_v31 }
 0x2df   :  { %v424_v42 = vpop.f32.mrf.mxu3 }
 0x2e0   :  { %v427_v4 = vadd.f32 %v424_v42, %v1002_v41 }
 0x2e7   :  { %v445_v43 = vpop.f32.mrf.mxu3 }
 0x2e8   :  { %v448_v44 = vsel %vm379_vm0, %v445_v43, -inf }
 0x2e9   :  { %449 = vmax.xlane.f32.xlu1 %v448_v44 }
 0x35c   :  { %v450_v49 = vpop.xlane.xlu1 %449 }
 0x35d   :  { %v451_v50 = vsub.f32 %v445_v43, %v450_v49 }
 0x35f   :  { %v452_v51 = vmul.f32 1.442695, %v451_v50 }
 0x361   :  { %674 = vpow2.f32 %v452_v51 }
 0x367   :  { %v675_v52 = vpop.eup %674 }
 0x368   :  { %v454_v53 = vsel %vm379_vm0, %v675_v52, 0.0 }
 0x369   :  { %455 = vadd.xlane.f32.xlu1 %v454_v53 }
 0x3dc   :  { %v456_v54 = vpop.xlane.xlu1 %455 }
 0x3dd   :  { %676 = vrcp.f32 %v456_v54  ;;  %v468_v58 = vand.u32 2147483648, %v456_v54  ;;  %v466_v60 = vand.u32 2147483647, %v456_v54  ;;  %vm462_vm6 = vweird.f32 %v456_v54 }
 0x3df   :  { %v469_v62 = vor.u32 1.1754944e-38, %v468_v58  ;;  %vm467_vm8 = vcmp.eq.f32.partialorder %v466_v60, 8.507059e+37 }
 0x3e3   :  { %v677_v55 = vpop.eup %676 }
 0x3e4   :  { %v458_v56 = vmul.f32 %v677_v55, %v456_v54  ;;  %vm463_vm5 = vweird.f32 %v677_v55 }
 0x3e5   :  { %vm464_vm7 = vmor %vm462_vm6, %vm463_vm5 }
 0x3e6   :  { %v459_v57 = vsub.f32 1.0, %v458_v56 }
 0x3e8   :  { %v460_v59 = vmul.f32 %v677_v55, %v459_v57 }
 0x3ea   :  { %v461_v61 = vadd.f32 %v677_v55, %v460_v59 }
 0x3ec   :  { %v465_v63 = vsel %vm464_vm7, %v677_v55, %v461_v61  ;;  %v669_v55 = vld [vmem:[%s1056_s9] ss:$0 sm:$0xff] }
 0x3ed   :  { %v470_v0 = vsel %vm467_vm8, %v469_v62, %v465_v63 }
 0x3ee   :  { %v471_v1 = vmul.f32 %v675_v52, %v470_v0 }
 0x3f0   :  { %640 = vmatmul.msk.f32.vlgmr.msrb.gmra.mxu3 %vm379_vm0, %v471_v1 }
 0x473   :  { %v492_v2 = vpop.f32.mrf.mxu3 }
 0x474   :  { %v495_v3 = vadd.f32 %v492_v2, %v1013_v13 }
 0x476   :  { %498 = vadd.xlane.f32.xlu2 %v495_v3 }
 0x47e   :  { %496 = vadd.xlane.f32.xlu2 %v427_v4 }
 0x4e9   :  { %v499_v11 = vpop.xlane.xlu2 %498 }
 0x4ea   :  { %v501_v12 = vmul.f32 0.03125, %v499_v11 }
 0x4ec   :  { %v506_v13 = vsub.f32 %v495_v3, %v501_v12 }
 0x4ee   :  { %v1028_v41 = vsel %vm504_vm9, %v506_v13, 0.0 }
 0x4ef   :  { %v510_v14 = vmul.f32 %v1028_v41, %v1028_v41 }
 0x4f1   :  { %513 = vadd.xlane.f32.xlu0 %v510_v14  ;;  %v497_v15 = vpop.xlane.xlu2 %496 }
 0x4f2   :  { %v500_v16 = vmul.f32 0.03125, %v497_v15 }
 0x4f4   :  { %v505_v17 = vsub.f32 %v427_v4, %v500_v16 }
 0x4f6   :  { %v1032_v18 = vsel %vm504_vm9, %v505_v17, 0.0 }
 0x4f7   :  { %v509_v19 = vmul.f32 %v1032_v18, %v1032_v18 }
 0x4f9   :  { %511 = vadd.xlane.f32.xlu1 %v509_v19 }
 0x564   :  { %v514_v32 = vpop.xlane.xlu0 %513 }
 0x565   :  { %v516_v33 = vmul.f32 0.03125, %v514_v32 }
 0x567   :  { %v518_v34 = vadd.f32 1e-05, %v516_v33 }
 0x569   :  { %678 = vrsqrt.f32 %v518_v34  ;;  %vm535_vm11 = vweird.f32 %v518_v34 }
 0x56c   :  { %v512_v35 = vpop.xlane.xlu1 %511 }
 0x56d   :  { %v515_v36 = vmul.f32 0.03125, %v512_v35 }
 0x56f   :  { %v679_v37 = vpop.eup %678  ;;  %v517_v38 = vadd.f32 1e-05, %v515_v36 }
 0x570   :  { %v530_v39 = vmul.f32 %v679_v37, %v518_v34  ;;  %vm536_vm10 = vweird.f32 %v679_v37 }
 0x571   :  { %680 = vrsqrt.f32 %v517_v38  ;;  %vm537_vm12 = vmor %vm535_vm11, %vm536_vm10  ;;  %vm525_vm14 = vweird.f32 %v517_v38 }
 0x572   :  { %v531_v40 = vmul.f32 %v679_v37, %v530_v39 }
 0x574   :  { %v532_v42 = vmul.f32 0.5, %v531_v40 }
 0x576   :  { %v533_v43 = vsub.f32 1.5, %v532_v42 }
 0x577   :  { %v681_v44 = vpop.eup %680 }
 0x578   :  { %v534_v45 = vmul.f32 %v679_v37, %v533_v43  ;;  %v520_v46 = vmul.f32 %v681_v44, %v517_v38  ;;  %vm526_vm13 = vweird.f32 %v681_v44 }
 0x579   :  { %vm527_vm15 = vmor %vm525_vm14, %vm526_vm13 }
 0x57a   :  { %v538_v47 = vsel %vm537_vm12, %v679_v37, %v534_v45  ;;  %v521_v48 = vmul.f32 %v681_v44, %v520_v46 }
 0x57b   :  { %v540_v49 = vmul.f32 %v538_v47, %v1028_v41 }
 0x57c   :  { %v522_v50 = vmul.f32 0.5, %v521_v48 }
 0x57d   :  { %580 = vmatmul.f32.vlgmr.msra.gmra.mxu3 %v540_v49 }
 0x57e   :  { %v523_v51 = vsub.f32 1.5, %v522_v50 }
 0x580   :  { %v524_v52 = vmul.f32 %v681_v44, %v523_v51 }
 0x582   :  { %v528_v53 = vsel %vm527_vm15, %v681_v44, %v524_v52 }
 0x583   :  { %v539_v54 = vmul.f32 %v528_v53, %v1032_v18 }
 0x585   :  { %577 = vmatmul.f32.vlgmr.msrb.gmra.mxu0 %v539_v54 }
 0x600   :  { %v581_v56 = vpop.f32.mrf.mxu3 }
 0x601   :  { %v582_v57 = vadd.f32 %v669_v55, %v581_v56 }
 0x602   :  { %v578_v58 = vpop.f32.mrf.mxu0 }
 0x603   :  { %585 = vst [vmem:[#allocation16 + $0x8] sm:$0xff] %v582_v57  ;;  %v579_v59 = vadd.f32 %v669_v55, %v578_v58 }
 0x605   :  { %584 = vst [vmem:[#allocation16] sm:$0xff] %v579_v59 }
 0x606   :  { %598 = dma.vmem_to_hbm [thread:$0]  %s591_s13, 256, %s593_s15, [#allocation7], %s876_s24, %s876_s24, %s877_s25  }
 0x607   :  { %872 = dma.done.wait [#allocation7], 256  }
 0x608   :  { %873 = vsyncadd [#allocation7], 4294967040 }
 0x609   :  { %603 = vsyncpa [#allocation6], 1 }
 0x60a   :  { %604 = vsyncpa [#allocation9], 1 }
 0x60b   :  { %605 = vsyncpa [#allocation12], 1 }
 0x60c   :  { %606 = vsyncpa [#allocation15], 1 }
 0x60d   :  { %607 = vsyncpa [#allocation7], 1 }

</bundles_post_ra>
